<compile_context>
chip_gen: v7x
topology: tpu7x:2x2x1
jax: 0.10.0
libtpu: 0.0.40
codegen_flags: <defaults>
</compile_context>

<pallas_src>
import jax
import jax.numpy as jnp
from jax.experimental import pallas as pl
from jax.experimental.pallas import tpu as pltpu

_LANE = 128
_SUBLANE = 8


def _round_up(x, m):
    return ((x + m - 1) // m) * m


def dynamic_ntk_kernel(x_ref, w1_ref, b1_ref, w2_ref, b2_ref, o_ref, acc_ref):
    """One (row-tile, hidden-chunk) grid step.

    x_ref  : (tm, Dp)  activation row tile (compute dtype)
    w1_ref : (Dp, th)  first-layer weight panel (compute dtype)
    b1_ref : (1,  th)  first-layer bias chunk (f32)
    w2_ref : (th, Dp)  second-layer weight panel (compute dtype)
    b2_ref : (1,  Dp)  second-layer bias (f32)
    o_ref  : (tm, Dp)  output row tile (written at the last hidden chunk)
    acc_ref: (tm, Dp)  f32 accumulator, resident across the hidden axis
    """
    hk = pl.program_id(1)

    @pl.when(hk == 0)
    def _():
        # Seed the accumulator with the (broadcast) second-layer bias so the
        # epilogue is a pure cast+store.
        acc_ref[...] = jnp.broadcast_to(b2_ref[...], acc_ref.shape)

    # First linear (panel): (tm, Dp) @ (Dp, th) -> f32 accumulation on MXU.
    h = jnp.dot(x_ref[...], w1_ref[...], preferred_element_type=jnp.float32)
    h = h + b1_ref[...]
    # relu(h) ** 2 kept in f32 vregs (VPU); cast only when feeding the MXU.
    h = jnp.maximum(h, 0.0)
    h = h * h
    # Second linear (panel): accumulate (tm, th) @ (th, Dp) into f32 scratch.
    acc_ref[...] += jnp.dot(h.astype(w2_ref.dtype), w2_ref[...],
                            preferred_element_type=jnp.float32)

    @pl.when(hk == pl.num_programs(1) - 1)
    def _():
        o_ref[...] = acc_ref[...].astype(o_ref.dtype)


def dynamic_ntk_layer(x, w1, b1, w2, b2, *, tm=256, th=512,
                      compute_dtype=jnp.bfloat16):
    """x: (B, S, D). w1: (D, 2D), b1: (2D,), w2: (2D, D), b2: (D,)."""
    B, S, D = x.shape
    H = w1.shape[1]  # 2 * D
    M = B * S

    # ---- lane/sublane-aligned, tile-divisible padded problem sizes ---------
    Dp = _round_up(D, _LANE)                       # output last dim lane-dense
    tm = _round_up(min(tm, _round_up(M, _SUBLANE)), _SUBLANE)
    Mp = _round_up(M, tm)
    # Pick the hidden tile to minimize padding: split Hp into n equal,
    # 128-aligned chunks instead of blindly rounding Hp up to a multiple of th.
    Hp = _round_up(H, _LANE)
    n_chunks = max(1, pl.cdiv(Hp, th))
    th = _round_up(pl.cdiv(Hp, n_chunks), _LANE)
    Hp = n_chunks * th

    f32 = jnp.float32
    x2d = jnp.pad(x.reshape(M, D).astype(compute_dtype),
                  ((0, Mp - M), (0, Dp - D)))
    w1p = jnp.pad(w1.astype(compute_dtype), ((0, Dp - D), (0, Hp - H)))
    w2p = jnp.pad(w2.astype(compute_dtype), ((0, Hp - H), (0, Dp - D)))
    b1p = jnp.pad(b1.astype(f32), ((0, Hp - H),)).reshape(1, Hp)
    b2p = jnp.pad(b2.astype(f32), ((0, Dp - D),)).reshape(1, Dp)

    grid = (Mp // tm, Hp // th)

    # ---- VMEM budget for the chosen tiles (double-buffered streamed blocks,
    #      single f32 accumulator), capped below v7x's 64 MiB physical VMEM.
    cbytes = jnp.dtype(compute_dtype).itemsize
    obytes = jnp.dtype(x.dtype).itemsize
    tile_bytes = (
        2 * tm * Dp * cbytes                 # x row tile (double-buffered)
        + 2 * tm * Dp * obytes               # output row tile
        + 2 * (Dp * th + th * Dp) * cbytes   # w1 / w2 panels
        + 2 * (th + Dp) * 4                  # bias blocks (f32)
        + tm * Dp * 4                        # accumulator scratch
    )
    vmem_limit = int(min(2 * tile_bytes + (8 << 20), 56 << 20))

    flops = 4 * Mp * Dp * Hp + 3 * Mp * Hp
    bytes_accessed = (Mp * Dp * (cbytes + obytes)
                      + 2 * Dp * Hp * cbytes + (Hp + Dp) * 4)

    out2d = pl.pallas_call(
        dynamic_ntk_kernel,
        out_shape=jax.ShapeDtypeStruct((Mp, Dp), x.dtype),
        grid_spec=pltpu.PrefetchScalarGridSpec(
            num_scalar_prefetch=0,
            grid=grid,
            in_specs=[
                pl.BlockSpec((tm, Dp), lambda i, hk: (i, 0)),   # x rows (resident over hk)
                pl.BlockSpec((Dp, th), lambda i, hk: (0, hk)),  # w1 panel
                pl.BlockSpec((1, th), lambda i, hk: (0, hk)),   # b1 chunk
                pl.BlockSpec((th, Dp), lambda i, hk: (hk, 0)),  # w2 panel
                pl.BlockSpec((1, Dp), lambda i, hk: (0, 0)),    # b2 (invariant)
            ],
            out_specs=pl.BlockSpec((tm, Dp), lambda i, hk: (i, 0)),
            scratch_shapes=[pltpu.VMEM((tm, Dp), jnp.float32)],
        ),
        compiler_params=pltpu.CompilerParams(
            dimension_semantics=("parallel", "arbitrary"),
            vmem_limit_bytes=vmem_limit,
        ),
        cost_estimate=pl.CostEstimate(
            flops=int(flops),
            transcendentals=0,
            bytes_accessed=int(bytes_accessed),
        ),
    )(x2d, w1p, b1p, w2p, b2p)

    return out2d[:M, :D].reshape(B, S, D)


def _reference(x, w1, b1, w2, b2):
    hi = jax.lax.Precision.HIGHEST
    h = jnp.einsum("bsd,dh->bsh", x, w1, precision=hi) + b1
    h = jnp.maximum(h, 0.0) ** 2
    return jnp.einsum("bsh,hd->bsd", h, w2, precision=hi) + b2


if __name__ == "__main__":
    # Small shapes consistent with the module: batch=2, seq=8, n_embd=32
    B, S, D = 2, 8, 32
    H = 2 * D

    key = jax.random.PRNGKey(0)
    kx, kw1, kb1, kw2, kb2 = jax.random.split(key, 5)

    x = jax.random.normal(kx, (B, S, D), dtype=jnp.float32)

    # Deterministic init mimicking nn.Linear (uniform(-1/sqrt(fan_in), ...)),
    # stored transposed: (in, out).
    lim1 = 1.0 / jnp.sqrt(jnp.float32(D))
    lim2 = 1.0 / jnp.sqrt(jnp.float32(H))
    w1 = jax.random.uniform(kw1, (D, H), jnp.float32, -lim1, lim1)
    b1 = jax.random.uniform(kb1, (H,), jnp.float32, -lim1, lim1)
    w2 = jax.random.uniform(kw2, (H, D), jnp.float32, -lim2, lim2)
    b2 = jax.random.uniform(kb2, (D,), jnp.float32, -lim2, lim2)

    ref = _reference(x, w1, b1, w2, b2)

    # f32 compute path: tight check of the kernel math / tiling.
    out_f32 = dynamic_ntk_layer(x, w1, b1, w2, b2, compute_dtype=jnp.float32)
    jax.block_until_ready(out_f32)
    assert out_f32.shape == (B, S, D)
    assert jnp.allclose(out_f32, ref, atol=1e-3, rtol=1e-3), "f32 mismatch vs reference"

    # bf16 compute path (production default): bf16 weights/activations on the
    # MXU with f32 accumulation -> slightly looser tolerance vs f32 reference
    # is expected and documented.
    out_bf16 = dynamic_ntk_layer(x, w1, b1, w2, b2, compute_dtype=jnp.bfloat16)
    jax.block_until_ready(out_bf16)
    assert out_bf16.shape == (B, S, D)
    assert jnp.allclose(out_bf16, ref, atol=5e-2, rtol=5e-2), "bf16 mismatch vs reference"

    print("KERNEL_OK")
</pallas_src>

<mosaic_0001>
module attributes {stable_mosaic.version = 11 : i64} {
  func.func @dynamic_ntk_kernel(%arg0: i32, %arg1: i32, %arg2: memref<16x128xf32, #tpu.memory_space<vmem>>, %arg3: memref<128x128xf32, #tpu.memory_space<vmem>>, %arg4: memref<1x128xf32, #tpu.memory_space<vmem>>, %arg5: memref<128x128xf32, #tpu.memory_space<vmem>>, %arg6: memref<1x128xf32, #tpu.memory_space<vmem>>, %arg7: memref<16x128xf32, #tpu.memory_space<vmem>>, %arg8: memref<16x128xf32, #tpu.memory_space<vmem>>) attributes {dimension_semantics = [#tpu.dimension_semantics<parallel>, #tpu.dimension_semantics<arbitrary>], iteration_bounds = array<i64: 1, 1>, scalar_prefetch = 0 : i64, scratch_operands = 1 : i64, tpu.core_type = #tpu.core_type<tc>, window_params = [{transform_indices = @transform_0, window_bounds = array<i64: 16, 128>}, {transform_indices = @transform_1, window_bounds = array<i64: 128, 128>}, {transform_indices = @transform_2, window_bounds = array<i64: 1, 128>}, {transform_indices = @transform_3, window_bounds = array<i64: 128, 128>}, {pipeline_mode = #tpu.pipeline_mode<synchronous>, transform_indices = @transform_4, window_bounds = array<i64: 1, 128>}, {transform_indices = @transform_5, window_bounds = array<i64: 16, 128>}]} {
    %c0_i32 = arith.constant 0 : i32
    %0 = arith.cmpi eq, %arg1, %c0_i32 : i32
    %1 = arith.extui %0 : i1 to i32
    %c0_i32_0 = arith.constant 0 : i32
    %2 = arith.cmpi ne, %1, %c0_i32_0 : i32
    scf.if %2 {
      %c0_16 = arith.constant 0 : index
      %c0_17 = arith.constant 0 : index
      %20 = vector.load %arg6[%c0_16, %c0_17] : memref<1x128xf32, #tpu.memory_space<vmem>>, vector<1x128xf32>
      %21 = vector.shape_cast %20 : vector<1x128xf32> to vector<1x128xf32>
      %22 = vector.broadcast %21 : vector<1x128xf32> to vector<16x128xf32>
      %c0_18 = arith.constant 0 : index
      %c0_19 = arith.constant 0 : index
      %23 = vector.load %arg8[%c0_18, %c0_19] : memref<16x128xf32, #tpu.memory_space<vmem>>, vector<16x128xf32>
      tpu.vector_store %arg8[%c0_18, %c0_19], %22 {strides = array<i32>} : memref<16x128xf32, #tpu.memory_space<vmem>>, vector<16x128xf32>,
    } else {
    }
    %c0 = arith.constant 0 : index
    %c0_1 = arith.constant 0 : index
    %3 = vector.load %arg2[%c0, %c0_1] : memref<16x128xf32, #tpu.memory_space<vmem>>, vector<16x128xf32>
    %c0_2 = arith.constant 0 : index
    %c0_3 = arith.constant 0 : index
    %4 = vector.load %arg3[%c0_2, %c0_3] : memref<128x128xf32, #tpu.memory_space<vmem>>, vector<128x128xf32>
    %cst = arith.constant dense<0.000000e+00> : vector<16x128xf32>
    %5 = tpu.matmul %3, %4, %cst {dimension_numbers = #tpu.dot_dimension_numbers<[1], [0], [0], [1], [0, 0, 1, 1], [], []>} : vector<16x128xf32>, vector<128x128xf32>, vector<16x128xf32> -> vector<16x128xf32>
    %c0_4 = arith.constant 0 : index
    %c0_5 = arith.constant 0 : index
    %6 = vector.load %arg4[%c0_4, %c0_5] : memref<1x128xf32, #tpu.memory_space<vmem>>, vector<1x128xf32>
    %7 = vector.broadcast %6 : vector<1x128xf32> to vector<16x128xf32>
    %8 = arith.addf %5, %7 : vector<16x128xf32>
    %cst_6 = arith.constant 0.000000e+00 : f32
    %9 = vector.broadcast %cst_6 : f32 to vector<16x128xf32>
    %10 = arith.maximumf %8, %9 : vector<16x128xf32>
    %11 = arith.mulf %10, %10 : vector<16x128xf32>
    %c0_7 = arith.constant 0 : index
    %c0_8 = arith.constant 0 : index
    %12 = vector.load %arg8[%c0_7, %c0_8] : memref<16x128xf32, #tpu.memory_space<vmem>>, vector<16x128xf32>
    %c0_9 = arith.constant 0 : index
    %c0_10 = arith.constant 0 : index
    %13 = vector.load %arg5[%c0_9, %c0_10] : memref<128x128xf32, #tpu.memory_space<vmem>>, vector<128x128xf32>
    %cst_11 = arith.constant dense<0.000000e+00> : vector<16x128xf32>
    %14 = tpu.matmul %11, %13, %cst_11 {dimension_numbers = #tpu.dot_dimension_numbers<[1], [0], [0], [1], [0, 0, 1, 1], [], []>} : vector<16x128xf32>, vector<128x128xf32>, vector<16x128xf32> -> vector<16x128xf32>
    %15 = arith.addf %12, %14 : vector<16x128xf32>
    %c0_12 = arith.constant 0 : index
    %c0_13 = arith.constant 0 : index
    %16 = vector.load %arg8[%c0_12, %c0_13] : memref<16x128xf32, #tpu.memory_space<vmem>>, vector<16x128xf32>
    tpu.vector_store %arg8[%c0_12, %c0_13], %15 {strides = array<i32>} : memref<16x128xf32, #tpu.memory_space<vmem>>, vector<16x128xf32>,
    %c0_i32_14 = arith.constant 0 : i32
    %17 = arith.cmpi eq, %arg1, %c0_i32_14 : i32
    %18 = arith.extui %17 : i1 to i32
    %c0_i32_15 = arith.constant 0 : i32
    %19 = arith.cmpi ne, %18, %c0_i32_15 : i32
    scf.if %19 {
      %c0_16 = arith.constant 0 : index
      %c0_17 = arith.constant 0 : index
      %20 = vector.load %arg8[%c0_16, %c0_17] : memref<16x128xf32, #tpu.memory_space<vmem>>, vector<16x128xf32>
      %c0_18 = arith.constant 0 : index
      %c0_19 = arith.constant 0 : index
      %21 = vector.load %arg7[%c0_18, %c0_19] : memref<16x128xf32, #tpu.memory_space<vmem>>, vector<16x128xf32>
      tpu.vector_store %arg7[%c0_18, %c0_19], %20 {strides = array<i32>} : memref<16x128xf32, #tpu.memory_space<vmem>>, vector<16x128xf32>,
    } else {
    }
    return
  }
  func.func @transform_0(%arg0: i32, %arg1: i32) -> (i32, i32) {
    %c0_i32 = arith.constant 0 : i32
    %c0_i32_0 = arith.constant 0 : i32
    return %arg0, %c0_i32 : i32, i32
  }
  func.func @transform_1(%arg0: i32, %arg1: i32) -> (i32, i32) {
    %c0_i32 = arith.constant 0 : i32
    %c0_i32_0 = arith.constant 0 : i32
    return %c0_i32, %arg1 : i32, i32
  }
  func.func @transform_2(%arg0: i32, %arg1: i32) -> (i32, i32) {
    %c0_i32 = arith.constant 0 : i32
    %c0_i32_0 = arith.constant 0 : i32
    return %c0_i32, %arg1 : i32, i32
  }
  func.func @transform_3(%arg0: i32, %arg1: i32) -> (i32, i32) {
    %c0_i32 = arith.constant 0 : i32
    %c0_i32_0 = arith.constant 0 : i32
    return %arg1, %c0_i32 : i32, i32
  }
  func.func @transform_4(%arg0: i32, %arg1: i32) -> (i32, i32) {
    %c0_i32 = arith.constant 0 : i32
    %c0_i32_0 = arith.constant 0 : i32
    %c0_i32_1 = arith.constant 0 : i32
    return %c0_i32, %c0_i32_0 : i32, i32
  }
  func.func @transform_5(%arg0: i32, %arg1: i32) -> (i32, i32) {
    %c0_i32 = arith.constant 0 : i32
    %c0_i32_0 = arith.constant 0 : i32
    return %arg0, %c0_i32 : i32, i32
  }
}

</mosaic_0001>

<bundles_post_ra>
// kernel: tpu_custom_call.1
= control target key start
LH: loop header
LB: loop body
LE: loop exit
PB: predicated region body
PF: predicated region fallthrough
CT: control target
= control target key end

     0   :  { %10 = vsyncpa [#allocation4], 0  ;;  %s682_s0 = inlined_call_operand.hbm [shape: f32[16,128], index: 0, kind: input, shape index: {}]   ;;  %s683_s1 = inlined_call_operand.hbm [shape: f32[128,128], index: 1, kind: input, shape index: {}]   ;;  %s684_s2 = inlined_call_operand.vmem [shape: f32[1,128], index: 2, kind: input, shape index: {}]   ;;  %s685_s3 = inlined_call_operand.hbm [shape: f32[128,128], index: 3, kind: input, shape index: {}]   ;;  %s686_s4 = inlined_call_operand.vmem [shape: f32[1,128], index: 4, kind: input, shape index: {}]   ;;  %s687_s5 = inlined_call_operand.hbm [shape: f32[16,128], index: 5, kind: output, shape index: {}]  }
   0x1   :  { %11 = vsyncpa [#allocation7], 0 }
   0x2   :  { %12 = vsyncpa [#allocation5], 0  ;;  %s573_s18 = smov [#allocation6]   ;;  %s574_s20 = smov [#allocation3]  }
   0x3   :  { %s30_s19 = sshll.u32 %s573_s18, 4  ;;  %s18_s21 = sshll.u32 %s574_s20, 4  ;;  %s31_s19 = int_to_ptr.vmem [resolvable:$true] %s30_s19  ;;  %s609_s21 = int_to_ptr.vmem [resolvable:$true] %s18_s21 }
   0x4   :  { %s479_s24 = scalar_lea.hbm %s683_s1, 2048 }
   0x5   :  { %p480_p0 = scmp.ne.s32.totalorder %s683_s1, %s479_s24  ;;  %p483_p1 = scmp.lt.u32.totalorder %s479_s24, %s683_s1 }
   0x7   :  { %p485_p2 = pnand %p483_p1, %p480_p0 }
   0x9   :  { %488 = shalt.err (!%p485_p2)
}
   0xa   :  { %s489_s29 = scalar_lea.vmem %s31_s19, 2048  ;;  %p494_p4 = scmp.lt.s32.totalorder %s31_s19, %s31_s19 }
   0xb   :  { %p490_p3 = scmp.ne.s32.totalorder %s31_s19, %s489_s29  ;;  %p495_p5 = scmp.lt.s32.totalorder %s489_s29, %s489_s29 }
   0xd   :  { %p496_p6 = por %p495_p5, %p494_p4 }
   0xf   :  { %p497_p7 = pnand %p496_p6, %p490_p3 }
  0x11   :  { %500 = shalt.err (!%p497_p7)
}
  0x12   :  { %s575_s30 = smov 128   ;;  %s576_s6 = smov 8  }
  0x13   :  { %36 = dma.hbm_to_vmem [thread:$0]  %s683_s1, 2048, %s31_s19, [#allocation7], %s575_s30, %s575_s30, %s576_s6  }
  0x14   :  { %s501_s11 = scalar_lea.hbm %s682_s0, 256 }
  0x15   :  { %p502_p8 = scmp.ne.s32.totalorder %s682_s0, %s501_s11  ;;  %p505_p9 = scmp.lt.u32.totalorder %s501_s11, %s682_s0 }
  0x17   :  { %p507_p10 = pnand %p505_p9, %p502_p8 }
  0x19   :  { %510 = shalt.err (!%p507_p10)
}
  0x1a   :  { %s511_s16 = scalar_lea.vmem %s609_s21, 256  ;;  %p516_p12 = scmp.lt.s32.totalorder %s609_s21, %s609_s21 }
  0x1b   :  { %p512_p11 = scmp.ne.s32.totalorder %s609_s21, %s511_s16  ;;  %p517_p13 = scmp.lt.s32.totalorder %s511_s16, %s511_s16 }
  0x1d   :  { %p518_p0 = por %p517_p13, %p516_p12 }
  0x1f   :  { %p519_p1 = pnand %p518_p0, %p512_p11 }
  0x21   :  { %522 = shalt.err (!%p519_p1)
}
  0x22   :  { %24 = dma.hbm_to_vmem [thread:$0]  %s682_s0, 256, %s609_s21, [#allocation4], %s575_s30, %s575_s30, %s576_s6  }
  0x23   :  { %s577_s18 = smov [#allocation8]   ;;  %s523_s23 = scalar_lea.hbm %s685_s3, 2048 }
  0x24   :  { %s44_s19 = sshll.u32 %s577_s18, 4  ;;  %p524_p2 = scmp.ne.s32.totalorder %s685_s3, %s523_s23  ;;  %s45_s19 = int_to_ptr.vmem [resolvable:$true] %s44_s19 }
  0x25   :  { %p527_p3 = scmp.lt.u32.totalorder %s523_s23, %s685_s3 }
  0x27   :  { %p529_p4 = pnand %p527_p3, %p524_p2 }
  0x29   :  { %532 = shalt.err (!%p529_p4)
}
  0x2a   :  { %s533_s28 = scalar_lea.vmem %s45_s19, 2048  ;;  %p538_p6 = scmp.lt.s32.totalorder %s45_s19, %s45_s19 }
  0x2b   :  { %p534_p5 = scmp.ne.s32.totalorder %s45_s19, %s533_s28  ;;  %p539_p7 = scmp.lt.s32.totalorder %s533_s28, %s533_s28 }
  0x2d   :  { %p540_p8 = por %p539_p7, %p538_p6 }
  0x2f   :  { %p541_p9 = pnand %p540_p8, %p534_p5 }
  0x31   :  { %544 = shalt.err (!%p541_p9)
}
  0x32   :  { %50 = dma.hbm_to_vmem [thread:$0]  %s685_s3, 2048, %s45_s19, [#allocation7], %s575_s30, %s575_s30, %s576_s6  }
  0x33   :  { %567 = dma.done.wait [#allocation4], 256  }
  0x34   :  { %568 = vsyncadd [#allocation4], 4294967040 }
  0x35   :  { %569 = dma.done.wait [#allocation7], 4096  }
  0x36   :  { %570 = vsyncadd [#allocation7], 4294963200  ;;  %v77_v0 = vld [vmem:[#allocation6] sm:$0xff]  ;;  %v78_v1 = vld [vmem:[#allocation6 + $0x8] sm:$0xff]  ;;  %s578_s9 = smov [#allocation9]  }
  0x37   :  { %v79_v2 = vld [vmem:[#allocation6 + $0x10] sm:$0xff]  ;;  %v409_v3 = vpack.c.bf16 %v78_v1, %v77_v0  ;;  %v80_v4 = vld [vmem:[#allocation6 + $0x18] sm:$0xff]  ;;  %v81_v6 = vld [vmem:[#allocation6 + $0x20] sm:$0xff]  ;;  %s288_s10 = sshll.u32 %s578_s9, 4  ;;  %s289_s10 = int_to_ptr.vmem [resolvable:$true] %s288_s10 }
  0x38   :  { %v413_v5 = vpack.c.bf16 %v80_v4, %v79_v2  ;;  %v82_v7 = vld [vmem:[#allocation6 + $0x28] sm:$0xff]  ;;  %v83_v9 = vld [vmem:[#allocation6 + $0x30] sm:$0xff]  ;;  %v84_v10 = vld [vmem:[#allocation6 + $0x38] sm:$0xff]  ;;  %p550_p11 = scmp.lt.s32.totalorder %s289_s10, %s289_s10 }
  0x39   :  { %410 = vmatprep.subr.bf16.mxu0 %v409_v3  ;;  %v417_v8 = vpack.c.bf16 %v82_v7, %v81_v6  ;;  %v75_v11 = vld [vmem:[#allocation3] sm:$0xff]  ;;  %v181_v12 = vld [vmem:[#allocation8] sm:$0xff]  ;;  %v182_v13 = vld [vmem:[#allocation8 + $0x8] sm:$0xff]  ;;  %v421_v20 = vpack.c.bf16 %v84_v10, %v83_v9 }
  0x3a   :  { %412 = vmatpush3.bf16.msra.mxu0 %v409_v3  ;;  %371 = vmatprep.mubr.f32.mxu0 %v75_v11  ;;  %v183_v14 = vld [vmem:[#allocation8 + $0x10] sm:$0xff]  ;;  %v441_v15 = vpack.c.bf16 %v182_v13, %v181_v12  ;;  %v184_v16 = vld [vmem:[#allocation8 + $0x18] sm:$0xff]  ;;  %v185_v18 = vld [vmem:[#allocation8 + $0x20] sm:$0xff] }
  0x3b   :  { %414 = vmatprep.subr.bf16.mxu0 %v413_v5  ;;  %v445_v17 = vpack.c.bf16 %v184_v16, %v183_v14  ;;  %v186_v19 = vld [vmem:[#allocation8 + $0x28] sm:$0xff]  ;;  %v85_v21 = vld [vmem:[#allocation6 + $0x40] sm:$0xff]  ;;  %v187_v24 = vld [vmem:[#allocation8 + $0x30] sm:$0xff] }
  0x3c   :  { %442 = vmatprep.subr.bf16.mxu1 %v441_v15  ;;  %v86_v22 = vld [vmem:[#allocation6 + $0x48] sm:$0xff]  ;;  %v449_v23 = vpack.c.bf16 %v186_v19, %v185_v18  ;;  %v188_v25 = vld [vmem:[#allocation8 + $0x38] sm:$0xff]  ;;  %v87_v27 = vld [vmem:[#allocation6 + $0x50] sm:$0xff] }
  0x3d   :  { %444 = vmatpush3.bf16.msra.mxu1 %v441_v15  ;;  %v425_v26 = vpack.c.bf16 %v86_v22, %v85_v21  ;;  %v88_v28 = vld [vmem:[#allocation6 + $0x58] sm:$0xff]  ;;  %v453_v29 = vpack.c.bf16 %v188_v25, %v187_v24  ;;  %v189_v30 = vld [vmem:[#allocation8 + $0x40] sm:$0xff]  ;;  %v190_v31 = vld [vmem:[#allocation8 + $0x48] sm:$0xff] }
  0x3e   :  { %416 = vmatpush3.bf16.msra.mxu0 %v413_v5  ;;  %446 = vmatprep.subr.bf16.mxu1 %v445_v17  ;;  %v429_v32 = vpack.c.bf16 %v88_v28, %v87_v27  ;;  %v89_v33 = vld [vmem:[#allocation6 + $0x60] sm:$0xff]  ;;  %v90_v34 = vld [vmem:[#allocation6 + $0x68] sm:$0xff]  ;;  %v457_v35 = vpack.c.bf16 %v190_v31, %v189_v30  ;;  %v191_v36 = vld [vmem:[#allocation8 + $0x50] sm:$0xff] }
  0x3f   :  { %418 = vmatprep.subr.bf16.mxu0 %v417_v8  ;;  %v192_v37 = vld [vmem:[#allocation8 + $0x58] sm:$0xff]  ;;  %v433_v38 = vpack.c.bf16 %v90_v34, %v89_v33  ;;  %v91_v39 = vld [vmem:[#allocation6 + $0x70] sm:$0xff]  ;;  %v193_v44 = vld [vmem:[#allocation8 + $0x60] sm:$0xff] }
  0x40   :  { %v92_v40 = vld [vmem:[#allocation6 + $0x78] sm:$0xff]  ;;  %v461_v41 = vpack.c.bf16 %v192_v37, %v191_v36  ;;  %v194_v45 = vld [vmem:[#allocation8 + $0x68] sm:$0xff]  ;;  %v195_v47 = vld [vmem:[#allocation8 + $0x70] sm:$0xff] }
  0x41   :  { %448 = vmatpush3.bf16.msra.mxu1 %v445_v17  ;;  %v437_v42 = vpack.c.bf16 %v92_v40, %v91_v39  ;;  %v76_v43 = vld [vmem:[#allocation3 + $0x8] sm:$0xff]  ;;  %v465_v46 = vpack.c.bf16 %v194_v45, %v193_v44  ;;  %v302_v50 = vld [vmem:[%s684_s2] ss:$0 sm:$0xff]  ;;  %s545_s2 = scalar_lea.vmem %s289_s10, 256 }
  0x42   :  { %420 = vmatpush3.bf16.msra.mxu0 %v417_v8  ;;  %450 = vmatprep.subr.bf16.mxu1 %v449_v23  ;;  %v196_v48 = vld [vmem:[#allocation8 + $0x78] sm:$0xff]  ;;  %v301_v59 = vld [vmem:[%s686_s4] ss:$0 sm:$0xff]  ;;  %p546_p10 = scmp.ne.s32.totalorder %s289_s10, %s545_s2  ;;  %p551_p12 = scmp.lt.s32.totalorder %s545_s2, %s545_s2 }
  0x43   :  { %422 = vmatprep.subr.bf16.mxu0 %v421_v20  ;;  %v469_v49 = vpack.c.bf16 %v196_v48, %v195_v47 }
  0x44   :  { %p552_p13 = por %p551_p12, %p550_p11 }
  0x45   :  { %452 = vmatpush3.bf16.msra.mxu1 %v449_v23 }
  0x46   :  { %424 = vmatpush3.bf16.msra.mxu0 %v421_v20  ;;  %454 = vmatprep.subr.bf16.mxu1 %v453_v29  ;;  %p553_p0 = pnand %p552_p13, %p546_p10 }
  0x47   :  { %426 = vmatprep.subr.bf16.mxu0 %v425_v26 }
  0x49   :  { %456 = vmatpush3.bf16.msra.mxu1 %v453_v29 }
  0x4a   :  { %428 = vmatpush3.bf16.msra.mxu0 %v425_v26  ;;  %458 = vmatprep.subr.bf16.mxu1 %v457_v35 }
  0x4b   :  { %430 = vmatprep.subr.bf16.mxu0 %v429_v32 }
  0x4d   :  { %460 = vmatpush3.bf16.msra.mxu1 %v457_v35 }
  0x4e   :  { %432 = vmatpush3.bf16.msra.mxu0 %v429_v32  ;;  %462 = vmatprep.subr.bf16.mxu1 %v461_v41 }
  0x4f   :  { %434 = vmatprep.subr.bf16.mxu0 %v433_v38 }
  0x51   :  { %464 = vmatpush3.bf16.msra.mxu1 %v461_v41 }
  0x52   :  { %436 = vmatpush3.bf16.msra.mxu0 %v433_v38  ;;  %466 = vmatprep.subr.bf16.mxu1 %v465_v46 }
  0x53   :  { %438 = vmatprep.subr.bf16.mxu0 %v437_v42 }
  0x55   :  { %468 = vmatpush3.bf16.msra.mxu1 %v465_v46 }
  0x56   :  { %440 = vmatpush3.bf16.msra.mxu0 %v437_v42  ;;  %470 = vmatprep.subr.bf16.mxu1 %v469_v49 }
  0x59   :  { %372 = vmatmul.mubr.f32.vlgmr.msra.gmra.mrb[0].mxu0 %v76_v43  ;;  %472 = vmatpush3.bf16.msra.mxu1 %v469_v49 }
 0x12c   :  { %v373_v51 = vpop.f32.mrb[0].mxu0 }
 0x12d   :  { %v172_v52 = vadd.f32 %v373_v51, %v302_v50  ;;  %v166_v53 = vpop.f32.mrb[1].mxu0 }
 0x12e   :  { %v167_v54 = vadd.f32 %v302_v50, %v166_v53 }
 0x12f   :  { %v176_v55 = vmax.f32 %v172_v52, 0.0 }
 0x130   :  { %v175_v56 = vmax.f32 %v167_v54, 0.0 }
 0x131   :  { %v178_v58 = vmul.f32 %v176_v55, %v176_v55 }
 0x132   :  { %v177_v57 = vmul.f32 %v175_v56, %v175_v56 }
 0x134   :  { %406 = vmatprep.mubr.f32.mxu1 %v177_v57 }
 0x135   :  { %407 = vmatmul.mubr.f32.vlgmr.msra.gmra.mrb[0].mxu1 %v178_v58 }
 0x208   :  { %v408_v60 = vpop.f32.mrb[0].mxu1 }
 0x209   :  { %v273_v61 = vadd.f32 %v408_v60, %v301_v59  ;;  %v263_v62 = vpop.f32.mrb[1].mxu1 }
 0x20a   :  { %v272_v63 = vadd.f32 %v301_v59, %v263_v62 }
 0x20b   :  { %282 = vst [vmem:[#allocation9 + $0x8] sm:$0xff] %v273_v61 }
 0x20c   :  { %281 = vst [vmem:[#allocation9] sm:$0xff] %v272_v63 }
 0x20d   :  { %556 = shalt.err (!%p553_p0)
}
 0x20e   :  { %s557_s4 = scalar_lea.hbm %s687_s5, 256 }
 0x20f   :  { %p558_p1 = scmp.ne.s32.totalorder %s687_s5, %s557_s4  ;;  %p561_p2 = scmp.lt.u32.totalorder %s557_s4, %s687_s5 }
 0x211   :  { %p563_p3 = pnand %p561_p2, %p558_p1 }
 0x213   :  { %566 = shalt.err (!%p563_p3)
}
 0x214   :  { %294 = dma.vmem_to_hbm [thread:$0]  %s289_s10, 256, %s687_s5, [#allocation5], %s575_s30, %s575_s30, %s576_s6  }
 0x215   :  { %571 = dma.done.wait [#allocation5], 256  }
 0x216   :  { %572 = vsyncadd [#allocation5], 4294967040 }
 0x217   :  { %298 = vsyncpa [#allocation4], 1 }
 0x218   :  { %299 = vsyncpa [#allocation7], 1 }
 0x219   :  { %300 = vsyncpa [#allocation5], 1 }

</bundles_post_ra>
